<compile_context>
chip_gen: v5e
topology: v5e:2x2
jax: 0.10.0
libtpu: 0.0.40
codegen_flags: <defaults>
</compile_context>

<pallas_src>
import functools

import jax
import jax.numpy as jnp
from jax.experimental import pallas as pl
from jax.experimental.pallas import tpu as pltpu


def _round_up(x, m):
    return (x + m - 1) // m * m


def _mlp_kernel(active_fun, padded_dims, col_off, x_ref, w_ref, b_ref, o_ref):
    """x_ref: (TB, P0); w_ref: (P_in_max, total_cols); b_ref: (1, total_cols)."""
    h = x_ref[...]                                    # already f32, no cast
    for l, act in enumerate(active_fun):
        p_in, p_out = padded_dims[l], padded_dims[l + 1]
        c0 = col_off[l]
        # Static slices; row offset 0 / lane offsets are multiples of 128 and
        # extents are multiples of (8, 128) -> no relayout, unmasked loads.
        w = w_ref[0:p_in, c0:c0 + p_out]
        b = b_ref[0:1, c0:c0 + p_out]                 # broadcasts over batch
        h = jnp.dot(h, w, preferred_element_type=jnp.float32) + b
        if act == 'sigmoid':
            h = jax.nn.sigmoid(h)                     # EUP logistic
        elif act == 'relu':
            h = jnp.maximum(h, 0.0)
        elif act == 'tanh':
            h = jnp.tanh(h)
        elif act == 'linear':
            pass
        else:
            raise ValueError(f"unknown activation: {act}")
    o_ref[...] = h                                    # lane-dense (128-wide) store


def neural_forward(x, weights, active_fun, *, block_b=512):
    """Batched MLP forward.

    x: (B, D0) f32; weights[l]: (D_l + 1, D_{l+1}) f32 (last row = bias),
    matching the PyTorch parameterization.  Returns (B, D_last) f32.
    """
    n_layers = len(weights)
    assert len(active_fun) == n_layers

    # Layer widths and 128-lane-padded widths.
    dims = [weights[0].shape[0] - 1] + [w.shape[1] for w in weights]
    pdims = [_round_up(max(d, 1), 128) for d in dims]

    # Column layout of the packed weight slab: layer l occupies
    # columns [col_off[l], col_off[l] + pdims[l+1]).
    col_off, total_cols = [], 0
    for l in range(n_layers):
        col_off.append(total_cols)
        total_cols += pdims[l + 1]
    p_in_max = max(pdims[:-1])

    # Host-side packing: split matmul part / bias row, zero-pad to alignment.
    w_slab = jnp.zeros((p_in_max, total_cols), jnp.float32)
    b_slab = jnp.zeros((1, total_cols), jnp.float32)
    for l, w in enumerate(weights):
        d_in, d_out = dims[l], dims[l + 1]
        c0 = col_off[l]
        w_slab = w_slab.at[:d_in, c0:c0 + d_out].set(w[:-1, :].astype(jnp.float32))
        b_slab = b_slab.at[:, c0:c0 + d_out].set(w[-1:, :].astype(jnp.float32))

    # Batch padding / tiling: 8-sublane aligned, blocks of <= block_b rows.
    B = x.shape[0]
    b_pad8 = _round_up(B, 8)
    tb = min(block_b, b_pad8)
    b_pad = _round_up(b_pad8, tb)
    x_pad = jnp.zeros((b_pad, pdims[0]), jnp.float32)
    x_pad = x_pad.at[:B, :dims[0]].set(x.astype(jnp.float32))

    kernel = functools.partial(
        _mlp_kernel, tuple(active_fun), tuple(pdims), tuple(col_off))

    out_padded = pl.pallas_call(
        kernel,
        out_shape=jax.ShapeDtypeStruct((b_pad, pdims[-1]), jnp.float32),
        grid=(b_pad // tb,),
        in_specs=[
            pl.BlockSpec((tb, pdims[0]), lambda i: (i, 0)),            # x tile
            pl.BlockSpec((p_in_max, total_cols), lambda i: (0, 0)),    # W slab (resident)
            pl.BlockSpec((1, total_cols), lambda i: (0, 0)),           # bias slab (resident)
        ],
        out_specs=pl.BlockSpec((tb, pdims[-1]), lambda i: (i, 0)),
        compiler_params=pltpu.CompilerParams(
            dimension_semantics=("parallel",)),
    )(x_pad, w_slab, b_slab)

    return out_padded[:B, :dims[-1]]


def neural_forward_ref(x, weights, active_fun):
    """Pure-JAX reference matching the PyTorch per-sample semantics."""
    h = x.astype(jnp.float32)
    for w, act in zip(weights, active_fun):
        h = h @ w[:-1, :] + w[-1:, :]
        if act == 'sigmoid':
            h = 1.0 / (1.0 + jnp.exp(-h))
        elif act == 'relu':
            h = jnp.maximum(h, 0.0)
        elif act == 'tanh':
            h = jnp.tanh(h)
    return h


if __name__ == "__main__":
    # Module config (matches Neural(layer_size, active_fun, batch)):
    layer_size = [16, 32, 32, 8]
    active_fun = ['relu', 'tanh', 'sigmoid']
    batch = 8

    key = jax.random.PRNGKey(0)
    k_x, *k_w = jax.random.split(key, 1 + len(layer_size) - 1)

    # Deterministic parameter init: 0.1 * uniform[0,1), shape (D_in+1, D_out),
    # same as 0.1 * torch.rand(layer_size[i] + 1, layer_size[i + 1]).
    weights = [
        0.1 * jax.random.uniform(
            k_w[i], (layer_size[i] + 1, layer_size[i + 1]), dtype=jnp.float32)
        for i in range(len(layer_size) - 1)
    ]

    # Inputs: X is a batch of vectors of size layer_size[0].
    x = jax.random.normal(k_x, (batch, layer_size[0]), dtype=jnp.float32)

    out = neural_forward(x, weights, active_fun)
    out = jax.block_until_ready(out)

    ref = neural_forward_ref(x, weights, active_fun)
    assert out.shape == (batch, layer_size[-1])
    assert jnp.allclose(out, ref, atol=1e-5, rtol=1e-5), "mismatch vs reference"

    print("KERNEL_OK")
</pallas_src>

<mosaic_0001>
module attributes {stable_mosaic.version = 11 : i64} {
  func.func @_mlp_kernel(%arg0: i32, %arg1: memref<8x128xf32, #tpu.memory_space<vmem>>, %arg2: memref<128x384xf32, #tpu.memory_space<vmem>>, %arg3: memref<1x384xf32, #tpu.memory_space<vmem>>, %arg4: memref<8x128xf32, #tpu.memory_space<vmem>>) attributes {dimension_semantics = [#tpu.dimension_semantics<parallel>], iteration_bounds = array<i64: 1>, scalar_prefetch = 0 : i64, scratch_operands = 0 : i64, tpu.core_type = #tpu.core_type<tc>, window_params = [{transform_indices = @transform_0, window_bounds = array<i64: 8, 128>}, {pipeline_mode = #tpu.pipeline_mode<synchronous>, transform_indices = @transform_1, window_bounds = array<i64: 128, 384>}, {pipeline_mode = #tpu.pipeline_mode<synchronous>, transform_indices = @transform_2, window_bounds = array<i64: 1, 384>}, {transform_indices = @transform_3, window_bounds = array<i64: 8, 128>}]} {
    %c0 = arith.constant 0 : index
    %c0_0 = arith.constant 0 : index
    %0 = vector.load %arg1[%c0, %c0_0] : memref<8x128xf32, #tpu.memory_space<vmem>>, vector<8x128xf32>
    %c0_1 = arith.constant 0 : index
    %c0_2 = arith.constant 0 : index
    %1 = vector.load %arg2[%c0_1, %c0_2] : memref<128x384xf32, #tpu.memory_space<vmem>>, vector<128x128xf32>
    %c0_3 = arith.constant 0 : index
    %c0_4 = arith.constant 0 : index
    %2 = vector.load %arg3[%c0_3, %c0_4] : memref<1x384xf32, #tpu.memory_space<vmem>>, vector<1x128xf32>
    %cst = arith.constant dense<0.000000e+00> : vector<8x128xf32>
    %3 = tpu.matmul %0, %1, %cst {dimension_numbers = #tpu.dot_dimension_numbers<[1], [0], [0], [1], [0, 0, 1, 1], [], []>} : vector<8x128xf32>, vector<128x128xf32>, vector<8x128xf32> -> vector<8x128xf32>
    %4 = vector.broadcast %2 : vector<1x128xf32> to vector<8x128xf32>
    %5 = arith.addf %3, %4 : vector<8x128xf32>
    %cst_5 = arith.constant 0.000000e+00 : f32
    %6 = vector.broadcast %cst_5 : f32 to vector<8x128xf32>
    %7 = arith.maximumf %5, %6 : vector<8x128xf32>
    %c0_6 = arith.constant 0 : index
    %c128 = arith.constant 128 : index
    %8 = vector.load %arg2[%c0_6, %c128] : memref<128x384xf32, #tpu.memory_space<vmem>>, vector<128x128xf32>
    %c0_7 = arith.constant 0 : index
    %c128_8 = arith.constant 128 : index
    %9 = vector.load %arg3[%c0_7, %c128_8] : memref<1x384xf32, #tpu.memory_space<vmem>>, vector<1x128xf32>
    %cst_9 = arith.constant dense<0.000000e+00> : vector<8x128xf32>
    %10 = tpu.matmul %7, %8, %cst_9 {dimension_numbers = #tpu.dot_dimension_numbers<[1], [0], [0], [1], [0, 0, 1, 1], [], []>} : vector<8x128xf32>, vector<128x128xf32>, vector<8x128xf32> -> vector<8x128xf32>
    %11 = vector.broadcast %9 : vector<1x128xf32> to vector<8x128xf32>
    %12 = arith.addf %10, %11 : vector<8x128xf32>
    %13 = math.tanh %12 : vector<8x128xf32>
    %c0_10 = arith.constant 0 : index
    %c256 = arith.constant 256 : index
    %14 = vector.load %arg2[%c0_10, %c256] : memref<128x384xf32, #tpu.memory_space<vmem>>, vector<128x128xf32>
    %c0_11 = arith.constant 0 : index
    %c256_12 = arith.constant 256 : index
    %15 = vector.load %arg3[%c0_11, %c256_12] : memref<1x384xf32, #tpu.memory_space<vmem>>, vector<1x128xf32>
    %cst_13 = arith.constant dense<0.000000e+00> : vector<8x128xf32>
    %16 = tpu.matmul %13, %14, %cst_13 {dimension_numbers = #tpu.dot_dimension_numbers<[1], [0], [0], [1], [0, 0, 1, 1], [], []>} : vector<8x128xf32>, vector<128x128xf32>, vector<8x128xf32> -> vector<8x128xf32>
    %17 = vector.broadcast %15 : vector<1x128xf32> to vector<8x128xf32>
    %18 = arith.addf %16, %17 : vector<8x128xf32>
    %19 = arith.negf %18 : vector<8x128xf32>
    %20 = math.exp %19 : vector<8x128xf32>
    %cst_14 = arith.constant 1.000000e+00 : f32
    %21 = vector.broadcast %cst_14 : f32 to vector<8x128xf32>
    %22 = arith.addf %21, %20 : vector<8x128xf32>
    %23 = arith.divf %21, %22 : vector<8x128xf32>
    %c0_15 = arith.constant 0 : index
    %c0_16 = arith.constant 0 : index
    %24 = vector.load %arg4[%c0_15, %c0_16] : memref<8x128xf32, #tpu.memory_space<vmem>>, vector<8x128xf32>
    tpu.vector_store %arg4[%c0_15, %c0_16], %23 {strides = array<i32>} : memref<8x128xf32, #tpu.memory_space<vmem>>, vector<8x128xf32>,
    return
  }
  func.func @transform_0(%arg0: i32) -> (i32, i32) {
    %c0_i32 = arith.constant 0 : i32
    %c0_i32_0 = arith.constant 0 : i32
    return %arg0, %c0_i32 : i32, i32
  }
  func.func @transform_1(%arg0: i32) -> (i32, i32) {
    %c0_i32 = arith.constant 0 : i32
    %c0_i32_0 = arith.constant 0 : i32
    %c0_i32_1 = arith.constant 0 : i32
    return %c0_i32, %c0_i32_0 : i32, i32
  }
  func.func @transform_2(%arg0: i32) -> (i32, i32) {
    %c0_i32 = arith.constant 0 : i32
    %c0_i32_0 = arith.constant 0 : i32
    %c0_i32_1 = arith.constant 0 : i32
    return %c0_i32, %c0_i32_0 : i32, i32
  }
  func.func @transform_3(%arg0: i32) -> (i32, i32) {
    %c0_i32 = arith.constant 0 : i32
    %c0_i32_0 = arith.constant 0 : i32
    return %arg0, %c0_i32 : i32, i32
  }
}

</mosaic_0001>

<bundles_post_ra>
// kernel: tpu_custom_call.1
= control target key start
LH: loop header
LB: loop body
LE: loop exit
PB: predicated region body
PF: predicated region fallthrough
CT: control target
= control target key end

     0   :  { %8 = vsyncpa [#allocation3], 0  ;;  %s375_s0 = inlined_call_operand.hbm [shape: f32[8,128], index: 0, kind: input, shape index: {}]   ;;  %s376_s1 = inlined_call_operand.hbm [shape: f32[128,384], index: 1, kind: input, shape index: {}]   ;;  %s377_s2 = inlined_call_operand.hbm [shape: f32[1,384], index: 2, kind: input, shape index: {}]   ;;  %s378_s3 = inlined_call_operand.hbm [shape: f32[8,128], index: 3, kind: output, shape index: {}]  }
   0x1   :  { %9 = vsyncpa [#allocation6], 0  ;;  %s26_s14 = sshll.u32 %s376_s1, 4  ;;  %s27_s14 = int_to_ptr.hbm [resolvable:$true] %s26_s14 }
   0x2   :  { %10 = vsyncpa [#allocation4], 0  ;;  %s337_s15 = smov [#allocation5]   ;;  %s16_s19 = sshll.u32 %s375_s0, 4  ;;  %s17_s19 = int_to_ptr.hbm [resolvable:$true] %s16_s19 }
   0x3   :  { %s28_s16 = sshll.u32 %s337_s15, 4  ;;  %s338_s20 = smov 384   ;;  %s29_s16 = int_to_ptr.vmem [resolvable:$true] %s28_s16 }
   0x4   :  { %s339_s21 = smov 24   ;;  %s340_s22 = smov [#allocation2]  }
   0x5   :  { %34 = dma.hbm_to_vmem [thread:$0]  %s27_s14, 6144, %s29_s16, [#allocation6], %s338_s20, %s338_s20, %s339_s21  }
   0x6   :  { %s18_s23 = sshll.u32 %s340_s22, 4  ;;  %s40_s26 = sshll.u32 %s377_s2, 4  ;;  %s19_s23 = int_to_ptr.vmem [resolvable:$true] %s18_s23  ;;  %s41_s26 = int_to_ptr.hbm [resolvable:$true] %s40_s26 }
   0x7   :  { %21 = dma.hbm_to_vmem [thread:$0]  %s17_s19, 128, %s19_s23, [#allocation3]  }
   0x8   :  { %s341_s1 = smov [#allocation7]  }
   0x9   :  { %s42_s27 = sshll.u32 %s341_s1, 4  ;;  %s43_s27 = int_to_ptr.vmem [resolvable:$true] %s42_s27 }
   0xa   :  { %45 = dma.hbm_to_vmem [thread:$0]  %s41_s26, 48, %s43_s27, [#allocation6]  }
   0xb   :  { %331 = dma.done.wait [#allocation3], 128  }
   0xc   :  { %332 = vsyncadd [#allocation3], 4294967168 }
   0xd   :  { %333 = dma.done.wait [#allocation6], 6192  }
   0xe   :  { %334 = vsyncadd [#allocation6], 4294961104  ;;  %v74_v0 = vld [vmem:[#allocation5 + $0x168] sm:$0xff]  ;;  %v73_v1 = vld [vmem:[#allocation5 + $0x150] sm:$0xff]  ;;  %s342_s0 = smov [#allocation8]   ;;  %s208_s30 = sshll.u32 %s378_s3, 4  ;;  %s209_s30 = int_to_ptr.hbm [resolvable:$true] %s208_s30 }
   0xf   :  { %79 = vmatpush.msra.mxu0 %v74_v0  ;;  %v72_v2 = vld [vmem:[#allocation5 + $0x138] sm:$0xff]  ;;  %v71_v3 = vld [vmem:[#allocation5 + $0x120] sm:$0xff]  ;;  %v115_v4 = vld [vmem:[#allocation5 + $0x170] sm:$0xff]  ;;  %s206_s2 = sshll.u32 %s342_s0, 4  ;;  %s207_s2 = int_to_ptr.vmem [resolvable:$true] %s206_s2 }
  0x10   :  { %v70_v5 = vld [vmem:[#allocation5 + $0x108] sm:$0xff]  ;;  %120 = vmatpush.msra.mxu1 %v115_v4  ;;  %v114_v6 = vld [vmem:[#allocation5 + $0x158] sm:$0xff]  ;;  %v113_v7 = vld [vmem:[#allocation5 + $0x140] sm:$0xff] }
  0x11   :  { %80 = vmatpush.msra.mxu0 %v73_v1  ;;  %v69_v8 = vld [vmem:[#allocation5 + $0xf0] sm:$0xff]  ;;  %v112_v9 = vld [vmem:[#allocation5 + $0x128] sm:$0xff]  ;;  %v68_v10 = vld [vmem:[#allocation5 + $0xd8] sm:$0xff] }
  0x12   :  { %121 = vmatpush.msra.mxu1 %v114_v6  ;;  %v111_v11 = vld [vmem:[#allocation5 + $0x110] sm:$0xff]  ;;  %v67_v12 = vld [vmem:[#allocation5 + $0xc0] sm:$0xff]  ;;  %v110_v13 = vld [vmem:[#allocation5 + $0xf8] sm:$0xff] }
  0x13   :  { %81 = vmatpush.msra.mxu0 %v72_v2  ;;  %v66_v14 = vld [vmem:[#allocation5 + $0xa8] sm:$0xff]  ;;  %v109_v15 = vld [vmem:[#allocation5 + $0xe0] sm:$0xff]  ;;  %v65_v16 = vld [vmem:[#allocation5 + $0x90] sm:$0xff] }
  0x14   :  { %122 = vmatpush.msra.mxu1 %v113_v7  ;;  %v108_v17 = vld [vmem:[#allocation5 + $0xc8] sm:$0xff]  ;;  %v64_v18 = vld [vmem:[#allocation5 + $0x78] sm:$0xff]  ;;  %v107_v19 = vld [vmem:[#allocation5 + $0xb0] sm:$0xff] }
  0x15   :  { %82 = vmatpush.msra.mxu0 %v71_v3  ;;  %v63_v20 = vld [vmem:[#allocation5 + $0x60] sm:$0xff]  ;;  %v106_v21 = vld [vmem:[#allocation5 + $0x98] sm:$0xff]  ;;  %v62_v22 = vld [vmem:[#allocation5 + $0x48] sm:$0xff] }
  0x16   :  { %123 = vmatpush.msra.mxu1 %v112_v9  ;;  %v105_v23 = vld [vmem:[#allocation5 + $0x80] sm:$0xff]  ;;  %v61_v24 = vld [vmem:[#allocation5 + $0x30] sm:$0xff]  ;;  %v104_v25 = vld [vmem:[#allocation5 + $0x68] sm:$0xff] }
  0x17   :  { %83 = vmatpush.msra.mxu0 %v70_v5  ;;  %v60_v26 = vld [vmem:[#allocation5 + $0x18] sm:$0xff]  ;;  %v103_v27 = vld [vmem:[#allocation5 + $0x50] sm:$0xff]  ;;  %v59_v28 = vld [vmem:[#allocation5] sm:$0xff] }
  0x18   :  { %124 = vmatpush.msra.mxu1 %v111_v11  ;;  %v58_v29 = vld [vmem:[#allocation2] sm:$0xff]  ;;  %v101_v31 = vld [vmem:[#allocation5 + $0x20] sm:$0xff]  ;;  %v100_v32 = vld [vmem:[#allocation5 + $0x8] sm:$0xff] }
  0x19   :  { %84 = vmatpush.msra.mxu0 %v69_v8  ;;  %v102_v30 = vld [vmem:[#allocation5 + $0x38] sm:$0xff]  ;;  %v155_v34 = vld [vmem:[#allocation5 + $0x160] sm:$0xff]  ;;  %v154_v35 = vld [vmem:[#allocation5 + $0x148] sm:$0xff] }
  0x1a   :  { %125 = vmatpush.msra.mxu1 %v110_v13  ;;  %v156_v33 = vld [vmem:[#allocation5 + $0x178] sm:$0xff]  ;;  %v153_v36 = vld [vmem:[#allocation5 + $0x130] sm:$0xff]  ;;  %v151_v38 = vld [vmem:[#allocation5 + $0x100] sm:$0xff] }
  0x1b   :  { %85 = vmatpush.msra.mxu0 %v68_v10  ;;  %161 = vmatpush.msra.mxu2 %v156_v33  ;;  %v152_v37 = vld [vmem:[#allocation5 + $0x118] sm:$0xff]  ;;  %v150_v39 = vld [vmem:[#allocation5 + $0xe8] sm:$0xff]  ;;  %v149_v40 = vld [vmem:[#allocation5 + $0xd0] sm:$0xff] }
  0x1c   :  { %126 = vmatpush.msra.mxu1 %v109_v15  ;;  %v148_v41 = vld [vmem:[#allocation5 + $0xb8] sm:$0xff]  ;;  %v147_v42 = vld [vmem:[#allocation5 + $0xa0] sm:$0xff]  ;;  %v146_v43 = vld [vmem:[#allocation5 + $0x88] sm:$0xff] }
  0x1d   :  { %86 = vmatpush.msra.mxu0 %v67_v12  ;;  %162 = vmatpush.msra.mxu2 %v155_v34  ;;  %v226_v44 = vld [vmem:[#allocation7] ss:$0 sm:$0xff]  ;;  %v145_v48 = vld [vmem:[#allocation5 + $0x70] sm:$0xff]  ;;  %v144_v49 = vld [vmem:[#allocation5 + $0x58] sm:$0xff] }
  0x1e   :  { %127 = vmatpush.msra.mxu1 %v108_v17  ;;  %v143_v50 = vld [vmem:[#allocation5 + $0x40] sm:$0xff]  ;;  %v142_v51 = vld [vmem:[#allocation5 + $0x28] sm:$0xff]  ;;  %v141_v52 = vld [vmem:[#allocation5 + $0x10] sm:$0xff] }
  0x1f   :  { %87 = vmatpush.msra.mxu0 %v66_v14  ;;  %163 = vmatpush.msra.mxu2 %v154_v35  ;;  %v227_v53 = vld [vmem:[#allocation7 + $0x1] ss:$0 sm:$0xff]  ;;  %v228_v57 = vld [vmem:[#allocation7 + $0x2] ss:$0 sm:$0xff] }
  0x20   :  { %128 = vmatpush.msra.mxu1 %v107_v19 }
  0x21   :  { %88 = vmatpush.msra.mxu0 %v65_v16  ;;  %164 = vmatpush.msra.mxu2 %v153_v36 }
  0x22   :  { %129 = vmatpush.msra.mxu1 %v106_v21 }
  0x23   :  { %89 = vmatpush.msra.mxu0 %v64_v18  ;;  %165 = vmatpush.msra.mxu2 %v152_v37 }
  0x24   :  { %130 = vmatpush.msra.mxu1 %v105_v23 }
  0x25   :  { %90 = vmatpush.msra.mxu0 %v63_v20  ;;  %166 = vmatpush.msra.mxu2 %v151_v38 }
  0x26   :  { %131 = vmatpush.msra.mxu1 %v104_v25 }
  0x27   :  { %91 = vmatpush.msra.mxu0 %v62_v22  ;;  %167 = vmatpush.msra.mxu2 %v150_v39 }
  0x28   :  { %132 = vmatpush.msra.mxu1 %v103_v27 }
  0x29   :  { %92 = vmatpush.msra.mxu0 %v61_v24  ;;  %168 = vmatpush.msra.mxu2 %v149_v40 }
  0x2a   :  { %133 = vmatpush.msra.mxu1 %v102_v30 }
  0x2b   :  { %93 = vmatpush.msra.mxu0 %v60_v26  ;;  %169 = vmatpush.msra.mxu2 %v148_v41 }
  0x2c   :  { %134 = vmatpush.msra.mxu1 %v101_v31 }
  0x2d   :  { %94 = vmatpush.msra.mxu0 %v59_v28  ;;  %170 = vmatpush.msra.mxu2 %v147_v42 }
  0x2e   :  { %95 = vmatmul.f32.vlgmr.msra.gmra.mxu0 %v58_v29  ;;  %135 = vmatpush.msra.mxu1 %v100_v32 }
  0x2f   :  { %171 = vmatpush.msra.mxu2 %v146_v43 }
  0x31   :  { %172 = vmatpush.msra.mxu2 %v145_v48 }
  0x33   :  { %173 = vmatpush.msra.mxu2 %v144_v49 }
  0x35   :  { %174 = vmatpush.msra.mxu2 %v143_v50 }
  0x37   :  { %175 = vmatpush.msra.mxu2 %v142_v51 }
  0x39   :  { %176 = vmatpush.msra.mxu2 %v141_v52 }
  0xab   :  { %v96_v45 = vpop.f32.mrf.mxu0 }
  0xac   :  { %v97_v46 = vadd.f32 %v226_v44, %v96_v45 }
  0xae   :  { %v99_v47 = vmax.f32 %v97_v46, 0.0 }
  0xb0   :  { %136 = vmatmul.f32.vlgmr.msra.gmra.mxu1 %v99_v47 }
 0x12d   :  { %v137_v54 = vpop.f32.mrf.mxu1 }
 0x12e   :  { %v138_v55 = vadd.f32 %v227_v53, %v137_v54 }
 0x130   :  { %229 = vtanh.f32 %v138_v55 }
 0x136   :  { %v230_v56 = vpop.eup %229 }
 0x137   :  { %177 = vmatmul.f32.vlgmr.msra.gmra.mxu2 %v230_v56 }
 0x1ba   :  { %v178_v58 = vpop.f32.mrf.mxu2 }
 0x1bb   :  { %v179_v59 = vadd.f32 %v228_v57, %v178_v58 }
 0x1bd   :  { %v219_v60 = vmul.f32 -1.442695, %v179_v59 }
 0x1bf   :  { %231 = vpow2.f32 %v219_v60 }
 0x1c5   :  { %v232_v61 = vpop.eup %231 }
 0x1c6   :  { %v184_v62 = vadd.f32 1.0, %v232_v61 }
 0x1c8   :  { %233 = vrcp.f32 %v184_v62  ;;  %v196_v2 = vand.u32 2147483648, %v184_v62  ;;  %v194_v4 = vand.u32 2147483647, %v184_v62  ;;  %vm190_vm1 = vweird.f32 %v184_v62 }
 0x1ca   :  { %v197_v6 = vor.u32 1.1754944e-38, %v196_v2  ;;  %vm195_vm3 = vcmp.eq.f32.partialorder %v194_v4, 8.507059e+37 }
 0x1ce   :  { %v234_v63 = vpop.eup %233 }
 0x1cf   :  { %v186_v0 = vmul.f32 %v234_v63, %v184_v62  ;;  %vm191_vm0 = vweird.f32 %v234_v63 }
 0x1d0   :  { %vm192_vm2 = vmor %vm190_vm1, %vm191_vm0 }
 0x1d1   :  { %v187_v1 = vsub.f32 1.0, %v186_v0 }
 0x1d3   :  { %v188_v3 = vmul.f32 %v234_v63, %v187_v1 }
 0x1d5   :  { %v189_v5 = vadd.f32 %v234_v63, %v188_v3 }
 0x1d7   :  { %v193_v7 = vsel %vm192_vm2, %v234_v63, %v189_v5 }
 0x1d8   :  { %v198_v8 = vsel %vm195_vm3, %v197_v6, %v193_v7 }
 0x1d9   :  { %200 = vst [vmem:[#allocation8] sm:$0xff] %v198_v8 }
 0x1da   :  { %211 = dma.vmem_to_hbm [thread:$0]  %s207_s2, 128, %s209_s30, [#allocation4]  }
 0x1db   :  { %335 = dma.done.wait [#allocation4], 128  }
 0x1dc   :  { %336 = vsyncadd [#allocation4], 4294967168 }
 0x1dd   :  { %216 = vsyncpa [#allocation3], 1 }
 0x1de   :  { %217 = vsyncpa [#allocation6], 1 }
 0x1df   :  { %218 = vsyncpa [#allocation4], 1 }

</bundles_post_ra>
